<compile_context>
chip_gen: v5e
topology: v5e:2x2
jax: 0.10.0
libtpu: 0.0.40
codegen_flags: <defaults>
</compile_context>

<pallas_src>
import functools

import jax
import jax.numpy as jnp
import numpy as np
from jax.experimental import pallas as pl
from jax.experimental.pallas import tpu as pltpu


def _vmem_capacity_bytes():
    """Physical VMEM of the local TPU generation (conservative fallback)."""
    try:
        info = pltpu.get_tpu_info()
        cap = getattr(info, "vmem_capacity_bytes", None)
        if cap:
            return int(cap)
    except Exception:
        pass
    return 64 << 20  # assume the smallest (v7x-sized) part if we cannot query


def _largest_dividing_tile(n, cap):
    """Largest t <= cap with t % 128 == 0 and n % t == 0 (or n if n <= cap).

    Falls back to the full dimension when no 128-multiple divisor exists: that
    may exceed the VMEM budget for exotic N, but never lets padded garbage
    enter the contraction.
    """
    if n <= cap:
        return int(n)
    t = (cap // 128) * 128
    while t >= 128:
        if n % t == 0:
            return int(t)
        t -= 128
    return int(n)


def _choose_tiles(n, adj_itemsize, vmem_cap):
    """Pick (TK, TN) for the adjacency (row, column) tiling, per generation."""
    if vmem_cap >= (100 << 20):   # v5e / v6e: 128 MiB VMEM parts
        adj_budget = 56 << 20
        tn_cap = 2048
    else:                         # v7x (64 MiB) or unknown: stay conservative
        adj_budget = 20 << 20
        tn_cap = 1024
    # Budget covers 2 adjacency streams x 2 pipeline buffers of (TK, TN) slabs.
    if 4 * n * n * adj_itemsize <= adj_budget:
        return int(n), int(n)                      # whole matrix fits: no tiling
    per_slab_elems = adj_budget // (4 * adj_itemsize)
    tn = _largest_dividing_tile(n, tn_cap)         # lane-dense output / adj cols
    tk_cap = max(per_slab_elems // max(tn, 1), 128)
    tk = _largest_dividing_tile(n, tk_cap)         # contraction rows
    return tk, tn


def _gcl_kernel(wx1_ref, wx2_ref, a1_ref, a2_ref, *rest, has_bias, mxu_dtype):
    # wx1_ref : (h1, TK)   wx2_ref : (h2, TK)   channel-mixed activations
    # a1_ref  : (TK, TN)   a2_ref  : (TK, TN)   adjacency slabs (HBM dtype)
    # b*_ref  : (h*, 1) f32 (optional)
    # o_ref   : (C_out, TN) f32
    # acc*    : (h*, TN) f32 scratch accumulators (live across the k axis)
    if has_bias:
        b1_ref, b2_ref, o_ref, acc1_ref, acc2_ref = rest
    else:
        o_ref, acc1_ref, acc2_ref = rest

    k = pl.program_id(2)

    @pl.when(k == 0)
    def _init():
        acc1_ref[...] = jnp.zeros_like(acc1_ref)
        acc2_ref[...] = jnp.zeros_like(acc2_ref)

    a1 = a1_ref[...]
    a2 = a2_ref[...]
    if a1.dtype != mxu_dtype:
        # f32 adjacency slabs arrive straight from HBM (read once, 4 B/elem);
        # cast the tile in VMEM so the MXU sees bf16 operands without a
        # separate memory-bound cast pass in the wrapper.
        a1 = a1.astype(mxu_dtype)
        a2 = a2.astype(mxu_dtype)
    wx1 = wx1_ref[...]
    wx2 = wx2_ref[...]
    if wx1.dtype != mxu_dtype:
        wx1 = wx1.astype(mxu_dtype)
        wx2 = wx2.astype(mxu_dtype)

    acc1_ref[...] += jnp.dot(wx1, a1, preferred_element_type=jnp.float32)
    acc2_ref[...] += jnp.dot(wx2, a2, preferred_element_type=jnp.float32)

    @pl.when(k == pl.num_programs(2) - 1)
    def _finalize():
        h1 = acc1_ref.shape[0]
        y1 = acc1_ref[...]
        y2 = acc2_ref[...]
        if has_bias:
            y1 = y1 + b1_ref[...]
            y2 = y2 + b2_ref[...]
        # Unmasked half-stores when C_out//2 is a multiple of 8 (f32 sublanes);
        # otherwise masked (correct, slower) — once per (b, j) tile.
        o_ref[:h1, :] = jnp.maximum(y1, 0.0).astype(o_ref.dtype)
        o_ref[h1:, :] = jnp.maximum(y2, 0.0).astype(o_ref.dtype)


def gcl_forward(x, adj1, adj2, weight, bias=None, *,
                compute_dtype=jnp.bfloat16, tile_n=None, tile_k=None):
    """Pallas implementation of GCL.forward.

    x      : (B, C_in, N) float32
    adj1   : (B, N, N)    adjacency_matrix_list[0] (f32; bf16 also accepted)
    adj2   : (B, N, N)    adjacency_matrix_list[1]
    weight : (C_out, C_in) float32
    bias   : optional (1, C_out, 1) float32
    returns: (B, C_out, N) float32
    """
    B, C_in, N = x.shape
    C_out = weight.shape[0]
    assert C_out >= 2, "GCL splits the output channels into two branches"
    h1 = C_out // 2
    h2 = C_out - h1
    has_bias = bias is not None
    mxu_dtype = jnp.dtype(compute_dtype)

    # Hoisted channel mixing (perf review #1): W @ x[b] is tiny compared to
    # the adjacency streams, so compute it once per batch here instead of
    # re-doing it for every (j, k) tile inside the kernel.
    wx = jnp.einsum("oc,bcn->bon", weight.astype(jnp.float32),
                    x.astype(jnp.float32),
                    precision=jax.lax.Precision.HIGHEST)
    wx = wx.astype(mxu_dtype)
    wx1 = wx[:, :h1, :]
    wx2 = wx[:, h1:, :]

    vmem_cap = _vmem_capacity_bytes()
    adj_itemsize = jnp.dtype(adj1.dtype).itemsize
    tk_auto, tn_auto = _choose_tiles(N, adj_itemsize, vmem_cap)
    tn = int(tile_n) if tile_n is not None else tn_auto
    tk = int(tile_k) if tile_k is not None else tk_auto
    assert N % tn == 0 and N % tk == 0, (N, tn, tk)
    n_j = N // tn
    n_k = N // tk

    in_specs = [
        pl.BlockSpec((None, h1, tk), lambda bi, j, k: (bi, 0, k)),   # wx1
        pl.BlockSpec((None, h2, tk), lambda bi, j, k: (bi, 0, k)),   # wx2
        pl.BlockSpec((None, tk, tn), lambda bi, j, k: (bi, k, j)),   # adj1
        pl.BlockSpec((None, tk, tn), lambda bi, j, k: (bi, k, j)),   # adj2
    ]
    args = [wx1, wx2, adj1, adj2]
    if has_bias:
        b2d = bias.reshape(C_out, 1).astype(jnp.float32)
        in_specs += [pl.BlockSpec((h1, 1), lambda bi, j, k: (0, 0)),
                     pl.BlockSpec((h2, 1), lambda bi, j, k: (0, 0))]
        args += [b2d[:h1], b2d[h1:]]

    # VMEM accounting: the two double-buffered adjacency streams dominate.
    # Cap the scoped limit at 80% of physical VMEM (headroom for Mosaic
    # internal scratch) — generation-aware, no hard-coded 64 MiB clamp.
    wx_itemsize = mxu_dtype.itemsize
    need = (4 * tk * tn * adj_itemsize          # adj1 + adj2, double-buffered
            + 2 * C_out * tk * wx_itemsize      # wx1 + wx2, double-buffered
            + 2 * C_out * tn * 4                # output block, double-buffered
            + C_out * tn * 4                    # f32 accumulators
            + (C_out * 4 if has_bias else 0))
    vmem_limit = int(min(max(int(need * 1.5), 16 << 20), int(vmem_cap * 0.8)))

    kernel = functools.partial(_gcl_kernel, has_bias=has_bias,
                               mxu_dtype=mxu_dtype)

    return pl.pallas_call(
        kernel,
        out_shape=jax.ShapeDtypeStruct((B, C_out, N), jnp.float32),
        grid=(B, n_j, n_k),
        in_specs=in_specs,
        out_specs=pl.BlockSpec((None, C_out, tn), lambda bi, j, k: (bi, 0, j)),
        scratch_shapes=[pltpu.VMEM((h1, tn), jnp.float32),
                        pltpu.VMEM((h2, tn), jnp.float32)],
        compiler_params=pltpu.CompilerParams(
            dimension_semantics=("parallel", "parallel", "arbitrary"),
            vmem_limit_bytes=vmem_limit),
    )(*args)


def gcl_reference(x, adj1, adj2, weight, bias=None):
    half = weight.shape[0] // 2
    hp = jax.lax.Precision.HIGHEST
    xa1 = jnp.einsum("bcn,bnm->bcm", x, adj1, precision=hp)
    xa2 = jnp.einsum("bcn,bnm->bcm", x, adj2, precision=hp)
    y1 = jnp.einsum("oc,bcm->bom", weight[:half], xa1, precision=hp)
    y2 = jnp.einsum("oc,bcm->bom", weight[half:], xa2, precision=hp)
    y = jnp.concatenate([y1, y2], axis=1)
    if bias is not None:
        y = y + bias
    return jnp.maximum(y, 0.0)


if __name__ == "__main__":
    B, C_in, C_out, N = 2, 8, 16, 16
    key = jax.random.PRNGKey(0)
    k_w, k_b, k_x, k_a1, k_a2 = jax.random.split(key, 5)

    # deterministic param init matching reset_parameters(): weight ~ N(0, 0.01)
    weight = 0.01 * jax.random.normal(k_w, (C_out, C_in), dtype=jnp.float32)
    stdv = 1.0 / np.sqrt(C_in)
    bias = jax.random.uniform(k_b, (1, C_out, 1), dtype=jnp.float32,
                              minval=-stdv, maxval=stdv)

    x = jax.random.normal(k_x, (B, C_in, N), dtype=jnp.float32)
    adj1 = jax.random.uniform(k_a1, (B, N, N), dtype=jnp.float32)
    adj2 = jax.random.uniform(k_a2, (B, N, N), dtype=jnp.float32)

    # 1) default bf16 MXU path, bias=False (module default): loose tolerance
    #    for the bf16 quantization of wx and the adjacency tiles.
    out = jax.block_until_ready(gcl_forward(x, adj1, adj2, weight, None))
    ref = gcl_reference(x, adj1, adj2, weight, None)
    np.testing.assert_allclose(np.asarray(out), np.asarray(ref),
                               rtol=3e-2, atol=3e-3)

    # 2) bf16 path with bias.
    out_b = jax.block_until_ready(gcl_forward(x, adj1, adj2, weight, bias))
    ref_b = gcl_reference(x, adj1, adj2, weight, bias)
    np.testing.assert_allclose(np.asarray(out_b), np.asarray(ref_b),
                               rtol=3e-2, atol=3e-3)

    # 3) f32 path on a larger graph with forced tiling: exercises the
    #    column (j) and contraction (k) grid axes plus the accumulator
    #    init/finalize path, at tighter tolerance.
    N2 = 256
    k_x2, k_a12, k_a22 = jax.random.split(jax.random.PRNGKey(1), 3)
    x2 = jax.random.normal(k_x2, (B, C_in, N2), dtype=jnp.float32)
    a12 = jax.random.uniform(k_a12, (B, N2, N2), dtype=jnp.float32)
    a22 = jax.random.uniform(k_a22, (B, N2, N2), dtype=jnp.float32)
    out2 = jax.block_until_ready(
        gcl_forward(x2, a12, a22, weight, bias,
                    compute_dtype=jnp.float32, tile_n=128, tile_k=128))
    ref2 = gcl_reference(x2, a12, a22, weight, bias)
    np.testing.assert_allclose(np.asarray(out2), np.asarray(ref2),
                               rtol=3e-3, atol=3e-4)

    print("KERNEL_OK")
</pallas_src>

<mosaic_0001>
module attributes {stable_mosaic.version = 11 : i64} {
  func.func @_gcl_kernel(%arg0: i32, %arg1: i32, %arg2: i32, %arg3: memref<1x8x16xbf16, #tpu.memory_space<vmem>>, %arg4: memref<1x8x16xbf16, #tpu.memory_space<vmem>>, %arg5: memref<1x16x16xf32, #tpu.memory_space<vmem>>, %arg6: memref<1x16x16xf32, #tpu.memory_space<vmem>>, %arg7: memref<1x16x16xf32, #tpu.memory_space<vmem>>, %arg8: memref<8x16xf32, #tpu.memory_space<vmem>>, %arg9: memref<8x16xf32, #tpu.memory_space<vmem>>) attributes {dimension_semantics = [#tpu.dimension_semantics<parallel>, #tpu.dimension_semantics<parallel>, #tpu.dimension_semantics<arbitrary>], iteration_bounds = array<i64: 2, 1, 1>, scalar_prefetch = 0 : i64, scratch_operands = 2 : i64, tpu.core_type = #tpu.core_type<tc>, window_params = [{transform_indices = @transform_0, window_bounds = array<i64: 1, 8, 16>}, {transform_indices = @transform_1, window_bounds = array<i64: 1, 8, 16>}, {transform_indices = @transform_2, window_bounds = array<i64: 1, 16, 16>}, {transform_indices = @transform_3, window_bounds = array<i64: 1, 16, 16>}, {transform_indices = @transform_4, window_bounds = array<i64: 1, 16, 16>}]} {
    %c0_i32 = arith.constant 0 : i32
    %0 = arith.cmpi eq, %arg2, %c0_i32 : i32
    %1 = arith.extui %0 : i1 to i32
    %c0_i32_0 = arith.constant 0 : i32
    %2 = arith.cmpi ne, %1, %c0_i32_0 : i32
    scf.if %2 {
      %cst_23 = arith.constant 0.000000e+00 : f32
      %24 = vector.broadcast %cst_23 : f32 to vector<8x16xf32>
      %c0_24 = arith.constant 0 : index
      %c0_25 = arith.constant 0 : index
      %25 = vector.load %arg8[%c0_24, %c0_25] : memref<8x16xf32, #tpu.memory_space<vmem>>, vector<8x16xf32>
      tpu.vector_store %arg8[%c0_24, %c0_25], %24 {strides = array<i32>} : memref<8x16xf32, #tpu.memory_space<vmem>>, vector<8x16xf32>,
      %cst_26 = arith.constant 0.000000e+00 : f32
      %26 = vector.broadcast %cst_26 : f32 to vector<8x16xf32>
      %c0_27 = arith.constant 0 : index
      %c0_28 = arith.constant 0 : index
      %27 = vector.load %arg9[%c0_27, %c0_28] : memref<8x16xf32, #tpu.memory_space<vmem>>, vector<8x16xf32>
      tpu.vector_store %arg9[%c0_27, %c0_28], %26 {strides = array<i32>} : memref<8x16xf32, #tpu.memory_space<vmem>>, vector<8x16xf32>,
    } else {
    }
    %c0 = arith.constant 0 : index
    %c0_1 = arith.constant 0 : index
    %c0_2 = arith.constant 0 : index
    %3 = vector.load %arg5[%c0, %c0_1, %c0_2] : memref<1x16x16xf32, #tpu.memory_space<vmem>>, vector<1x16x16xf32>
    %4 = vector.shape_cast %3 : vector<1x16x16xf32> to vector<16x16xf32>
    %c0_3 = arith.constant 0 : index
    %c0_4 = arith.constant 0 : index
    %c0_5 = arith.constant 0 : index
    %5 = vector.load %arg6[%c0_3, %c0_4, %c0_5] : memref<1x16x16xf32, #tpu.memory_space<vmem>>, vector<1x16x16xf32>
    %6 = vector.shape_cast %5 : vector<1x16x16xf32> to vector<16x16xf32>
    %7 = arith.truncf %4 : vector<16x16xf32> to vector<16x16xbf16>
    %8 = arith.truncf %6 : vector<16x16xf32> to vector<16x16xbf16>
    %c0_6 = arith.constant 0 : index
    %c0_7 = arith.constant 0 : index
    %c0_8 = arith.constant 0 : index
    %9 = vector.load %arg3[%c0_6, %c0_7, %c0_8] : memref<1x8x16xbf16, #tpu.memory_space<vmem>>, vector<1x8x16xbf16>
    %10 = vector.shape_cast %9 : vector<1x8x16xbf16> to vector<8x16xbf16>
    %c0_9 = arith.constant 0 : index
    %c0_10 = arith.constant 0 : index
    %c0_11 = arith.constant 0 : index
    %11 = vector.load %arg4[%c0_9, %c0_10, %c0_11] : memref<1x8x16xbf16, #tpu.memory_space<vmem>>, vector<1x8x16xbf16>
    %12 = vector.shape_cast %11 : vector<1x8x16xbf16> to vector<8x16xbf16>
    %c0_12 = arith.constant 0 : index
    %c0_13 = arith.constant 0 : index
    %13 = vector.load %arg8[%c0_12, %c0_13] : memref<8x16xf32, #tpu.memory_space<vmem>>, vector<8x16xf32>
    %cst = arith.constant dense<0.000000e+00> : vector<8x16xf32>
    %14 = tpu.matmul %10, %7, %cst {dimension_numbers = #tpu.dot_dimension_numbers<[1], [0], [0], [1], [0, 0, 1, 1], [], []>} : vector<8x16xbf16>, vector<16x16xbf16>, vector<8x16xf32> -> vector<8x16xf32>
    %15 = arith.addf %13, %14 : vector<8x16xf32>
    %c0_14 = arith.constant 0 : index
    %c0_15 = arith.constant 0 : index
    %16 = vector.load %arg8[%c0_14, %c0_15] : memref<8x16xf32, #tpu.memory_space<vmem>>, vector<8x16xf32>
    tpu.vector_store %arg8[%c0_14, %c0_15], %15 {strides = array<i32>} : memref<8x16xf32, #tpu.memory_space<vmem>>, vector<8x16xf32>,
    %c0_16 = arith.constant 0 : index
    %c0_17 = arith.constant 0 : index
    %17 = vector.load %arg9[%c0_16, %c0_17] : memref<8x16xf32, #tpu.memory_space<vmem>>, vector<8x16xf32>
    %cst_18 = arith.constant dense<0.000000e+00> : vector<8x16xf32>
    %18 = tpu.matmul %12, %8, %cst_18 {dimension_numbers = #tpu.dot_dimension_numbers<[1], [0], [0], [1], [0, 0, 1, 1], [], []>} : vector<8x16xbf16>, vector<16x16xbf16>, vector<8x16xf32> -> vector<8x16xf32>
    %19 = arith.addf %17, %18 : vector<8x16xf32>
    %c0_19 = arith.constant 0 : index
    %c0_20 = arith.constant 0 : index
    %20 = vector.load %arg9[%c0_19, %c0_20] : memref<8x16xf32, #tpu.memory_space<vmem>>, vector<8x16xf32>
    tpu.vector_store %arg9[%c0_19, %c0_20], %19 {strides = array<i32>} : memref<8x16xf32, #tpu.memory_space<vmem>>, vector<8x16xf32>,
    %c0_i32_21 = arith.constant 0 : i32
    %21 = arith.cmpi eq, %arg2, %c0_i32_21 : i32
    %22 = arith.extui %21 : i1 to i32
    %c0_i32_22 = arith.constant 0 : i32
    %23 = arith.cmpi ne, %22, %c0_i32_22 : i32
    scf.if %23 {
      %c0_23 = arith.constant 0 : index
      %c0_24 = arith.constant 0 : index
      %24 = vector.load %arg8[%c0_23, %c0_24] : memref<8x16xf32, #tpu.memory_space<vmem>>, vector<8x16xf32>
      %c0_25 = arith.constant 0 : index
      %c0_26 = arith.constant 0 : index
      %25 = vector.load %arg9[%c0_25, %c0_26] : memref<8x16xf32, #tpu.memory_space<vmem>>, vector<8x16xf32>
      %cst_27 = arith.constant 0.000000e+00 : f32
      %26 = vector.broadcast %cst_27 : f32 to vector<8x16xf32>
      %27 = arith.maximumf %24, %26 : vector<8x16xf32>
      %c0_28 = arith.constant 0 : index
      %c0_29 = arith.constant 0 : index
      %c0_30 = arith.constant 0 : index
      %28 = vector.load %arg7[%c0_28, %c0_29, %c0_30] : memref<1x16x16xf32, #tpu.memory_space<vmem>>, vector<1x8x16xf32>
      %29 = vector.shape_cast %28 : vector<1x8x16xf32> to vector<8x16xf32>
      %30 = vector.shape_cast %27 : vector<8x16xf32> to vector<1x8x16xf32>
      tpu.vector_store %arg7[%c0_28, %c0_29, %c0_30], %30 {strides = array<i32>} : memref<1x16x16xf32, #tpu.memory_space<vmem>>, vector<1x8x16xf32>,
      %cst_31 = arith.constant 0.000000e+00 : f32
      %31 = vector.broadcast %cst_31 : f32 to vector<8x16xf32>
      %32 = arith.maximumf %25, %31 : vector<8x16xf32>
      %c0_32 = arith.constant 0 : index
      %c8 = arith.constant 8 : index
      %c0_33 = arith.constant 0 : index
      %33 = vector.load %arg7[%c0_32, %c8, %c0_33] : memref<1x16x16xf32, #tpu.memory_space<vmem>>, vector<1x8x16xf32>
      %34 = vector.shape_cast %33 : vector<1x8x16xf32> to vector<8x16xf32>
      %35 = vector.shape_cast %32 : vector<8x16xf32> to vector<1x8x16xf32>
      tpu.vector_store %arg7[%c0_32, %c8, %c0_33], %35 {strides = array<i32>} : memref<1x16x16xf32, #tpu.memory_space<vmem>>, vector<1x8x16xf32>,
    } else {
    }
    return
  }
  func.func @transform_0(%arg0: i32, %arg1: i32, %arg2: i32) -> (i32, i32, i32) {
    %c0_i32 = arith.constant 0 : i32
    %c0_i32_0 = arith.constant 0 : i32
    return %arg0, %c0_i32, %arg2 : i32, i32, i32
  }
  func.func @transform_1(%arg0: i32, %arg1: i32, %arg2: i32) -> (i32, i32, i32) {
    %c0_i32 = arith.constant 0 : i32
    %c0_i32_0 = arith.constant 0 : i32
    return %arg0, %c0_i32, %arg2 : i32, i32, i32
  }
  func.func @transform_2(%arg0: i32, %arg1: i32, %arg2: i32) -> (i32, i32, i32) {
    %c0_i32 = arith.constant 0 : i32
    return %arg0, %arg2, %arg1 : i32, i32, i32
  }
  func.func @transform_3(%arg0: i32, %arg1: i32, %arg2: i32) -> (i32, i32, i32) {
    %c0_i32 = arith.constant 0 : i32
    return %arg0, %arg2, %arg1 : i32, i32, i32
  }
  func.func @transform_4(%arg0: i32, %arg1: i32, %arg2: i32) -> (i32, i32, i32) {
    %c0_i32 = arith.constant 0 : i32
    %c0_i32_0 = arith.constant 0 : i32
    return %arg0, %c0_i32, %arg1 : i32, i32, i32
  }
}

</mosaic_0001>

<bundles_post_ra>
// kernel: tpu_custom_call.1
= control target key start
LH: loop header
LB: loop body
LE: loop exit
PB: predicated region body
PF: predicated region fallthrough
CT: control target
= control target key end

     0   :  { %s1158_s0 = inlined_call_operand.hbm [shape: bf16[2,8,16], index: 0, kind: input, shape index: {}]   ;;  %s1159_s1 = inlined_call_operand.hbm [shape: bf16[2,8,16], index: 1, kind: input, shape index: {}]   ;;  %s1160_s2 = inlined_call_operand.hbm [shape: f32[2,16,16], index: 2, kind: input, shape index: {}]   ;;  %s1161_s3 = inlined_call_operand.hbm [shape: f32[2,16,16], index: 3, kind: input, shape index: {}]   ;;  %s1162_s4 = inlined_call_operand.hbm [shape: f32[2,16,16], index: 4, kind: output, shape index: {}]  }
   0x1   :  { %1169 = sst [smem:[#allocation23_spill]] %s1159_s1 }
   0x2   :  { %9 = vsyncpa [#allocation5], 0 }
   0x3   :  { %11 = vsyncpa [#allocation5 + $0x1], 0 }
   0x4   :  { %12 = vsyncpa [#allocation8], 0 }
   0x5   :  { %14 = vsyncpa [#allocation8 + $0x1], 0 }
   0x6   :  { %15 = vsyncpa [#allocation11], 0 }
   0x7   :  { %17 = vsyncpa [#allocation11 + $0x1], 0 }
   0x8   :  { %18 = vsyncpa [#allocation6], 0 }
   0x9   :  { %20 = vsyncpa [#allocation6 + $0x1], 0  ;;  %s975_s15 = smov 0   ;;  %s977_s16 = smov 0  }
   0xa   :  { %s979_s17 = smov 0   ;;  %s981_s18 = smov 0  }
   0xb   :  { %s983_s19 = smov 0   ;;  %s985_s20 = smov 0  }
   0xc LB: > { %1170 = sst [smem:[#allocation17_spill]] %s931_s17  ;;  %s1006_s21 = sadd.s32 4294967295, %s943_s20   ;;  %s943_s20 = sphi %s985_s20, %s26_s20   ;;  %s939_s19 = sphi %s983_s19, %s1188_s19   ;;  %s935_s18 = sphi %s981_s18, %s1187_s18   ;;  %s931_s17 = sphi %s979_s17, %s1186_s17   ;;  %s927_s16 = sphi %s977_s16, %s1190_s16   ;;  %s923_s15 = sphi %s975_s15, %s1189_s15  }
   0xd   : > { %1171 = sst [smem:[#allocation18_spill]] %s939_s19  ;;  %s622_s22 = sadd.s32 4294967294, %s943_s20  }
   0xe   : > { %1172 = sst [smem:[#allocation19_spill]] %s943_s20  ;;  %s45_s23 = sadd.s32 1, %s939_s19 }
   0xf   : > { %s54_s24 = sadd.s32 1, %s931_s17  ;;  %p47_p0 = scmp.ge.s32.totalorder %s45_s23, 2 }
  0x10   : > { %p61_p1 = scmp.ne.s32.totalorder %s931_s17, %s927_s16  ;;  %p62_p2 = scmp.eq.s32.totalorder %s943_s20, 0 }
  0x11   : > { %p67_p3 = scmp.ne.s32.totalorder %s927_s16, %s923_s15  ;;  %s1192_s23 = smov (%p47_p0, %s45_s23), 0 }
  0x12   : > { %1173 = sst [smem:[#allocation20_spill]] %s1192_s23  ;;  %p1018_p4 = por %p62_p2, %p61_p1 }
  0x13   : > { %p68_p5 = scmp.eq.s32.totalorder %s1006_s21, 0  ;;  %s49_s26 = ssub.s32 %s939_s19, %s1192_s23 }
  0x14   : > { %p181_p6 = scmp.eq.s32.totalorder %s1006_s21, 1  ;;  %p52_p7 = scmp.eq.s32.totalorder %s49_s26, 0 }
  0x15   : > { %p1026_p8 = por %p68_p5, %p67_p3  ;;  %p187_p10 = scmp.eq.s32.totalorder %s622_s22, 1 }
  0x16   : > { %p1030_p9 = por %p181_p6, %p61_p1  ;;  %p624_p12 = scmp.ge.s32.totalorder %s943_s20, 2 }
  0x17   : > { %s1035_s29 = scalar_select %p52_p7, %s931_s17, %s54_s24  }
  0x18   : > { %p1037_p11 = por %p187_p10, %p67_p3  ;;  %p678_p13 = scmp.lt.s32.totalorder %s943_s20, 2 }
  0x19   : > { %1177 = sst [smem:[#allocation21_spill]] %s1035_s29  ;;  %s1044_s5 = sand.u32 1, %s931_s17  }
  0x1a   : > { %s1178_s30 = scalar_select %p1037_p11, 1, 0 }
  0x1b   : > { %s625_s6 = sshll.u32 %s1044_s5, 2  ;;  %s626_s7 = sshll.u32 %s939_s19, 2 }
  0x1c   : > { %1179 = sst [smem:[#allocation22_spill]] %s1178_s30  ;;  %p1050_p0 = pnand %p678_p13, %p1018_p4 }
  0x1d   : > { %s227_s9 = sand.u32 1, %s943_s20   ;;  %s1181_s1 = sld [smem:[#allocation23_spill]] }
  0x1e   : > { %s231_s14 = scalar_lea.vmem [#allocation7], %s625_s6  ;;  %s228_s24 = scalar_lea.sflag [#allocation8], %s227_s9 }
  0x1f   : > { %s240_s22 = sshll.u32 %s231_s14, 4  ;;  %s629_s25 = sshll.u32 %s1044_s5, 4  ;;  %s241_s22 = int_to_ptr.vmem [resolvable:$true] %s240_s22 }
  0x20   : > { %s648_s26 = sshll.u32 %s939_s19, 4  ;;  %p635_p1 = scmp.ge.s32.totalorder %s943_s20, 1 }
  0x21   : > { %p295_p2 = scmp.lt.s32.totalorder %s943_s20, 3  ;;  %s208_s9 = scalar_lea.sflag [#allocation5], %s1044_s5 }
  0x22   : > { %s259_s19 = scalar_lea.hbm %s1160_s2, %s648_s26  ;;  %s251_s20 = scalar_lea.vmem [#allocation9], %s629_s25 }
  0x23   : > { %s236_s12 = scalar_lea.hbm %s1181_s1, %s626_s7  ;;  %p1064_p3 = pnand %p635_p1, %p295_p2 }
  0x24   : > { %s238_s13 = sshll.u32 %s236_s12, 4  ;;  %s216_s12 = scalar_lea.hbm %s1158_s0, %s626_s7  ;;  %s239_s13 = int_to_ptr.hbm [resolvable:$true] %s238_s13 }
  0x25   : > { %667 = dma.hbm_to_vmem [thread:$0]  (!%p1050_p0), %s239_s13, 64, %s241_s22, %s228_s24  }
  0x26   : > { %s218_s14 = sshll.u32 %s216_s12, 4  ;;  %s211_s1 = scalar_lea.vmem [#allocation4], %s625_s6  ;;  %s219_s14 = int_to_ptr.hbm [resolvable:$true] %s218_s14 }
  0x27   : > { %s220_s29 = sshll.u32 %s211_s1, 4  ;;  %s260_s17 = sshll.u32 %s259_s19, 4  ;;  %s221_s29 = int_to_ptr.vmem [resolvable:$true] %s220_s29  ;;  %s261_s17 = int_to_ptr.hbm [resolvable:$true] %s260_s17 }
  0x28   : > { %664 = dma.hbm_to_vmem [thread:$0]  (!%p1050_p0), %s219_s14, 64, %s221_s29, %s208_s9  }
  0x29   : > { %s262_s30 = sshll.u32 %s251_s20, 4  ;;  %s945_s7 = smov 128   ;;  %s263_s30 = int_to_ptr.vmem [resolvable:$true] %s262_s30 }
  0x2a   : > { %s946_s10 = smov 8   ;;  %s284_s11 = scalar_lea.hbm %s1161_s3, %s648_s26 }
  0x2b   : > { %670 = dma.hbm_to_vmem [thread:$0]  (!%p1050_p0), %s261_s17, 256, %s263_s30, %s228_s24, %s945_s7, %s945_s7, %s946_s10  }
  0x2c   : > { %s276_s29 = scalar_lea.vmem [#allocation10], %s629_s25  ;;  %s285_s14 = sshll.u32 %s284_s11, 4  ;;  %s286_s14 = int_to_ptr.hbm [resolvable:$true] %s285_s14 }
  0x2d   : > { %s287_s12 = sshll.u32 %s276_s29, 4  ;;  %s273_s9 = scalar_lea.sflag [#allocation11], %s1044_s5  ;;  %s288_s12 = int_to_ptr.vmem [resolvable:$true] %s287_s12 }
  0x2e   : > { %673 = dma.hbm_to_vmem [thread:$0]  (!%p1050_p0), %s286_s14, 256, %s288_s12, %s273_s9, %s945_s7, %s945_s7, %s946_s10  }
  0x2f   : > { %299 = sbr.rel (%p1064_p3) target bundleno = 208 (0xd0), region = 36  ;;  %s1088_s19 = sand.u32 (!%p1064_p3), 1, %s927_s16  }
  0x30   : > { %s636_s17 = sshll.u32 (!%p1064_p3), %s1088_s19, 2  ;;  %s302_s20 = scalar_lea.sflag (!%p1064_p3), [#allocation5], %s1088_s19 }
  0x31   : > { %s305_s30 = scalar_lea.vmem (!%p1064_p3), [#allocation4], %s636_s17 }
  0x34   : > { %906 = dma.done.wait (%p1026_p8), %s302_s20, 64  }
  0x35   : > { %908 = vsyncadd (%p1026_p8), %s302_s20, 4294967232  ;;  %s311_s5 = sand.u32 1, %s1006_s21   ;;  %s315_s23 = scalar_lea.vmem [#allocation7], %s636_s17 }
  0x36   : > { %s312_s8 = scalar_lea.sflag [#allocation8], %s311_s5 }
  0x37   : > { %910 = dma.done.wait (%p1026_p8), %s312_s8, 320  }
  0x38   : > { %912 = vsyncadd (%p1026_p8), %s312_s8, 4294966976  ;;  %s1102_s24 = sshll.u32 %s1088_s19, 4  ;;  %s332_s26 = scalar_lea.sflag [#allocation11], %s1088_s19 }
  0x39   : > { %s325_s25 = scalar_lea.vmem [#allocation9], %s1102_s24  ;;  %s335_s13 = scalar_lea.vmem [#allocation10], %s1102_s24 }
  0x3a   : > { %914 = dma.done.wait (%p1026_p8), %s332_s26, 256  }
  0x3b   : > { %916 = vsyncadd (%p1026_p8), %s332_s26, 4294967040  ;;  %vm383_vm0 = vcmask 130048   ;;  %v947_v0 = vmov 0.0   ;;  %v386_v1 = vld [vmem:[%s325_s25] sm:$0xff]  ;;  %v387_v2 = vld [vmem:[%s325_s25 + $0x8] sm:$0xff]  ;;  %s650_s21 = sshll.u32 %s935_s18, 4 }
  0x3c   : > { %384 = vst.msk [vmem:[#allocation2] sm:$0xff] %vm383_vm0, %v947_v0  ;;  %v388_v3 = vld [vmem:[%s335_s13] sm:$0xff]  ;;  %v390_v4 = vpack.c.bf16 %v387_v2, %v386_v1  ;;  %v389_v5 = vld [vmem:[%s335_s13 + $0x8] sm:$0xff]  ;;  %s455_s7 = scalar_lea.hbm %s1162_s4, %s650_s21  ;;  %s375_s10 = scalar_lea.vmem [#allocation12], %s1102_s24 }
  0x3d   : > { %385 = vst.msk [vmem:[#allocation3] sm:$0xff] %vm383_vm0, %v947_v0  ;;  %v391_v6 = vpack.c.bf16 %v389_v5, %v388_v3  ;;  %v392_v7 = vld [vmem:[%s305_s30] sm:$0xf]  ;;  %v393_v8 = vld [vmem:[%s315_s23] sm:$0xf]  ;;  %s456_s1 = sshll.u32 %s375_s10, 4  ;;  %s457_s1 = int_to_ptr.vmem [resolvable:$true] %s456_s1 }
  0x3e   : > { %406 = vmatpush.bf16.msra.mxu0 %v390_v4  ;;  %s458_s6 = sshll.u32 %s455_s7, 4  ;;  %s443_s18 = scalar_lea.sflag [#allocation6], %s1088_s19  ;;  %s459_s6 = int_to_ptr.hbm [resolvable:$true] %s458_s6 }
  0x3f   : > { %425 = vmatpush.bf16.msra.mxu1 %v391_v6  ;;  %s867_s11 = sshra.s32 %s459_s6, 4  ;;  %s873_s9 = scalar_lea.hbm %s1162_s4, 32  ;;  %s868_s11 = int_to_ptr.hbm [resolvable:$true] %s867_s11 }
  0x40   : > { %s869_s29 = scalar_lea.hbm %s868_s11, 16  ;;  %p874_p7 = scmp.lt.s32.totalorder %s868_s11, %s1162_s4 }
  0x41   : > { %641 = vmatmul.msk.bf16.vlgmr.msra.gmra.mxu0 %vm383_vm0, %v392_v7  ;;  %p870_p4 = scmp.ne.s32.totalorder %s868_s11, %s869_s29  ;;  %p875_p8 = scmp.lt.s32.totalorder %s873_s9, %s869_s29 }
  0x42   : > { %642 = vmatmul.msk.bf16.vlgmr.msra.gmra.mxu1 %vm383_vm0, %v393_v8 }
  0x43   : > { %v394_v9 = vld [vmem:[#allocation2] sm:$0xff]  ;;  %p871_p5 = pnand %p870_p4, %p1030_p9  ;;  %p876_p10 = por %p875_p8, %p874_p7 }
  0x44   : > { %v414_v10 = vld [vmem:[#allocation3] sm:$0xff] }
  0x45   : > { %p872_p6 = pneg %p871_p5 }
  0x47   : > { %p877_p13 = pnand %p876_p10, %p872_p6 }
  0xbe   : > { %v408_v11 = vpop.f32.mrf.mxu0 }
  0xbf   : > { %v412_v12 = vadd.f32 %v408_v11, %v394_v9  ;;  %v427_v13 = vpop.f32.mrf.mxu1 }
  0xc0   : > { %v431_v14 = vadd.f32 %v427_v13, %v414_v10 }
  0xc1   : > { %413 = vst.msk [vmem:[#allocation2] sm:$0xff] %vm383_vm0, %v412_v12 }
  0xc2   : > { %432 = vst.msk [vmem:[#allocation3] sm:$0xff] %vm383_vm0, %v431_v14 }
  0xc6   : > { %v410_v15 = vpop.f32.mrf.mxu0 }
  0xc7   : > { %v429_v16 = vpop.f32.mrf.mxu1 }
  0xc8   : > { %v436_v17 = vld [vmem:[#allocation2] sm:$0xff] }
  0xc9   : > { %v437_v18 = vld [vmem:[#allocation3] sm:$0xff]  ;;  %v438_v19 = vmax.f32 %v436_v17, 0.0 }
  0xca   : > { %v440_v20 = vmax.f32 %v437_v18, 0.0 }
  0xcb   : > { %439 = vst.msk [vmem:[%s375_s10] sm:$0xff] %vm383_vm0, %v438_v19 }
  0xcc   : > { %441 = vst.msk [vmem:[%s375_s10 + $0x8] sm:$0xff] %vm383_vm0, %v440_v20 }
  0xcd   : > { %880 = shalt.err (!%p877_p13)
}
  0xce   : > { %s948_s19 = smov 128   ;;  %s949_s30 = smov 8  }
  0xcf   : > { %659 = dma.vmem_to_hbm [thread:$0]  (%p1030_p9), %s457_s1, 256, %s459_s6, %s443_s18, %s948_s19, %s948_s19, %s949_s30  }
  0xd0 PF: > { %s1184_s8 = sld [smem:[#allocation19_spill]]  ;;  %s473_s23 = sand.u32 1, %s923_s15  }
  0xd1   : > { %p675_p0 = pnand %p624_p12, %p1037_p11  ;;  %s474_s24 = scalar_lea.sflag [#allocation6], %s473_s23 }
  0xd3   : > { %p676_p1 = pneg %p675_p0 }
  0xd5   : > { %918 = dma.done.wait (%p676_p1), %s474_s24, 256  }
  0xd6   : > { %920 = vsyncadd (%p676_p1), %s474_s24, 4294967040  ;;  %s26_s20 = sadd.s32 1, %s1184_s8   ;;  %s1185_s25 = sld [smem:[#allocation17_spill]] }
  0xd7   : > { %p23_p2 = scmp.ge.s32.totalorder %s26_s20, 4   ;;  %s1186_s17 = sld [smem:[#allocation21_spill]] }
  0xd8   : > { %s1187_s18 = sld [smem:[#allocation18_spill]]  ;;  %s1189_s15 = smov %s927_s16 }
  0xd9   : > { %s1188_s19 = sld [smem:[#allocation20_spill]]  ;;  %25 = sbr.rel (!%p23_p2) target bundleno = 12 (0xc), region = 126 }
  0xdc   : > { %s1190_s16 = smov %s1185_s25 }
  0xde   :  { %480 = vsyncpa [#allocation5], 1 }
  0xdf   :  { %482 = vsyncpa [#allocation5 + $0x1], 1 }
  0xe0   :  { %483 = vsyncpa [#allocation8], 1 }
  0xe1   :  { %485 = vsyncpa [#allocation8 + $0x1], 1 }
  0xe2   :  { %486 = vsyncpa [#allocation11], 1 }
  0xe3   :  { %488 = vsyncpa [#allocation11 + $0x1], 1 }
  0xe4   :  { %489 = vsyncpa [#allocation6], 1 }
  0xe5   :  { %491 = vsyncpa [#allocation6 + $0x1], 1 }

</bundles_post_ra>
